<compile_context>
chip_gen: v5e
topology: v5e:2x2
jax: 0.10.0
libtpu: 0.0.40
codegen_flags: <defaults>
</compile_context>

<pallas_src>
import jax
import jax.numpy as jnp
from jax.experimental import pallas as pl
from jax.experimental.pallas import tpu as pltpu


def _mlp_kernel(x_ref, w1t_ref, b1_ref, w2t_ref, b2_ref, o_ref):
    # fc1: (tb, D) @ (D, H) -> (tb, H), f32 accumulation on the MXU.
    h = jnp.dot(x_ref[...], w1t_ref[...], preferred_element_type=jnp.float32)
    h = jnp.maximum(h + b1_ref[...], 0.0)                 # bias (1, H) broadcasts over rows
    # fc2: (tb, H) @ (H, O) -> (tb, O).
    z = jnp.dot(h.astype(w2t_ref.dtype), w2t_ref[...],
                preferred_element_type=jnp.float32)
    z = z + b2_ref[...]                                    # bias (1, O)
    # Sigmoid lowers to the EUP slot, which is idle relative to the DMA-bound pipeline.
    o_ref[...] = jax.nn.sigmoid(z).astype(o_ref.dtype)


def _round_up(n, m):
    return ((n + m - 1) // m) * m


def binary_classifier_forward(x, w1, b1, w2, b2, *, block_b=None):
    """Forward pass of BinaryClassifier.

    x : (B, D)            input (f32, or bf16 if supplied end-to-end by the caller)
    w1: (H, D)  fc1.weight  (PyTorch layout: out_features x in_features)
    b1: (H,)    fc1.bias
    w2: (O, H)  fc2.weight
    b2: (O,)    fc2.bias
    Returns (B, O) float32.
    """
    B, D = x.shape
    H, D2 = w1.shape
    O, H2 = w2.shape
    assert D == D2 and H == H2

    # Batch tile (sublane axis -> multiple of 8).  Cap at 16384 rows: at D=32 f32 that is
    # ~2 MiB per x tile (~4 MiB double-buffered), safely inside v5e's 16 MiB scoped-VMEM
    # default and big enough to amortize the ~0.35 us per-step overhead on v6e/v7x.
    # For very large B the cap keeps the grid long (>= 8 steps) so pipelining and v7x's
    # two TensorCores are both fed; for small/medium B a single or few tiles suffice.
    if block_b is None:
        cap = 16384
        if B <= cap:
            block_b = _round_up(max(B, 8), 8)
        else:
            block_b = min(cap, _round_up(pl.cdiv(B, 8), 8))
    assert block_b % 8 == 0

    # Wrapper-side plumbing touches only the tiny weights (32x64, 64x1): transpose once,
    # match x's dtype for the MXU feed.  x itself is never copied / transposed / cast.
    w1t = w1.T.astype(x.dtype)                    # (D, H)
    w2t = w2.T.astype(x.dtype)                    # (H, O)
    b1_2d = b1.reshape(1, H).astype(jnp.float32)
    b2_2d = b2.reshape(1, O).astype(jnp.float32)

    elem = jnp.dtype(x.dtype).itemsize
    cost = pl.CostEstimate(
        flops=2 * B * (D * H + H * O),
        transcendentals=B * O,
        bytes_accessed=B * D * elem                      # x read (the dominant term)
                       + (D * H + H * O) * elem          # weights
                       + (H + O) * 4                     # biases
                       + B * O * 4,                      # output write
    )

    grid = (pl.cdiv(B, block_b),)                        # ragged last block handled by Pallas
    out = pl.pallas_call(
        _mlp_kernel,
        out_shape=jax.ShapeDtypeStruct((B, O), jnp.float32),
        grid_spec=pltpu.PrefetchScalarGridSpec(
            num_scalar_prefetch=0,
            grid=grid,
            in_specs=[
                pl.BlockSpec((block_b, D), lambda i: (i, 0)),   # contiguous x slab per step
                pl.BlockSpec((D, H), lambda i: (0, 0)),         # w1T resident
                pl.BlockSpec((1, H), lambda i: (0, 0)),         # b1
                pl.BlockSpec((H, O), lambda i: (0, 0)),         # w2T resident
                pl.BlockSpec((1, O), lambda i: (0, 0)),         # b2
            ],
            out_specs=pl.BlockSpec((block_b, O), lambda i: (i, 0)),
        ),
        compiler_params=pltpu.CompilerParams(
            dimension_semantics=("parallel",),
        ),
        cost_estimate=cost,
    )(x, w1t, b1_2d, w2t, b2_2d)

    return out                                           # (B, O), no post-processing


def init_params(key, input_size, hidden_size, output_size):
    """Deterministic init mimicking nn.Linear's uniform(-1/sqrt(fan_in), 1/sqrt(fan_in)).
    Weights are kept in PyTorch layout (out_features, in_features)."""
    k1, k2, k3, k4 = jax.random.split(key, 4)
    lim1 = 1.0 / jnp.sqrt(jnp.float32(input_size))
    lim2 = 1.0 / jnp.sqrt(jnp.float32(hidden_size))
    w1 = jax.random.uniform(k1, (hidden_size, input_size), jnp.float32, -lim1, lim1)
    b1 = jax.random.uniform(k2, (hidden_size,), jnp.float32, -lim1, lim1)
    w2 = jax.random.uniform(k3, (output_size, hidden_size), jnp.float32, -lim2, lim2)
    b2 = jax.random.uniform(k4, (output_size,), jnp.float32, -lim2, lim2)
    return w1, b1, w2, b2


def _reference(x, w1, b1, w2, b2):
    return jax.nn.sigmoid(jnp.maximum(x @ w1.T + b1, 0.0) @ w2.T + b2)


if __name__ == "__main__":
    D, H, O = 32, 64, 1
    key = jax.random.PRNGKey(0)
    kx, kp, kx2 = jax.random.split(key, 3)
    w1, b1, w2, b2 = init_params(kp, D, H, O)

    # Small shape consistent with the module: batch=8, single tile, natural layout.
    B = 8
    x = jax.random.normal(kx, (B, D), dtype=jnp.float32)
    out = binary_classifier_forward(x, w1, b1, w2, b2)
    out = jax.block_until_ready(out)
    ref = _reference(x, w1, b1, w2, b2)
    assert out.shape == (B, O)
    assert jnp.allclose(out, ref, atol=1e-5, rtol=1e-5), "mismatch vs reference (B=8)"

    # Multi-step grid with a non-tile-aligned batch: exercises the ragged last block
    # (no wrapper-side padding; out-of-range rows are never written back).
    B2 = 300
    x2 = jax.random.normal(kx2, (B2, D), dtype=jnp.float32)
    out2 = binary_classifier_forward(x2, w1, b1, w2, b2, block_b=128)
    out2 = jax.block_until_ready(out2)
    ref2 = _reference(x2, w1, b1, w2, b2)
    assert out2.shape == (B2, O)
    assert jnp.allclose(out2, ref2, atol=1e-5, rtol=1e-5), "mismatch vs reference (B=300)"

    print("KERNEL_OK")
</pallas_src>

<mosaic_0001>
module attributes {stable_mosaic.version = 11 : i64} {
  func.func @_mlp_kernel(%arg0: i32, %arg1: memref<8x32xf32, #tpu.memory_space<vmem>>, %arg2: memref<32x64xf32, #tpu.memory_space<vmem>>, %arg3: memref<1x64xf32, #tpu.memory_space<vmem>>, %arg4: memref<64x1xf32, #tpu.memory_space<vmem>>, %arg5: memref<1x1xf32, #tpu.memory_space<vmem>>, %arg6: memref<8x1xf32, #tpu.memory_space<vmem>>) attributes {dimension_semantics = [#tpu.dimension_semantics<parallel>], iteration_bounds = array<i64: 1>, scalar_prefetch = 0 : i64, scratch_operands = 0 : i64, tpu.core_type = #tpu.core_type<tc>, window_params = [{transform_indices = @transform_0, window_bounds = array<i64: 8, 32>}, {pipeline_mode = #tpu.pipeline_mode<synchronous>, transform_indices = @transform_1, window_bounds = array<i64: 32, 64>}, {pipeline_mode = #tpu.pipeline_mode<synchronous>, transform_indices = @transform_2, window_bounds = array<i64: 1, 64>}, {pipeline_mode = #tpu.pipeline_mode<synchronous>, transform_indices = @transform_3, window_bounds = array<i64: 64, 1>}, {pipeline_mode = #tpu.pipeline_mode<synchronous>, transform_indices = @transform_4, window_bounds = array<i64: 1, 1>}, {transform_indices = @transform_5, window_bounds = array<i64: 8, 1>}]} {
    %c0 = arith.constant 0 : index
    %c0_0 = arith.constant 0 : index
    %0 = vector.load %arg1[%c0, %c0_0] : memref<8x32xf32, #tpu.memory_space<vmem>>, vector<8x32xf32>
    %c0_1 = arith.constant 0 : index
    %c0_2 = arith.constant 0 : index
    %1 = vector.load %arg2[%c0_1, %c0_2] : memref<32x64xf32, #tpu.memory_space<vmem>>, vector<32x64xf32>
    %cst = arith.constant dense<0.000000e+00> : vector<8x64xf32>
    %2 = tpu.matmul %0, %1, %cst {dimension_numbers = #tpu.dot_dimension_numbers<[1], [0], [0], [1], [0, 0, 1, 1], [], []>} : vector<8x32xf32>, vector<32x64xf32>, vector<8x64xf32> -> vector<8x64xf32>
    %c0_3 = arith.constant 0 : index
    %c0_4 = arith.constant 0 : index
    %3 = vector.load %arg3[%c0_3, %c0_4] : memref<1x64xf32, #tpu.memory_space<vmem>>, vector<1x64xf32>
    %4 = vector.broadcast %3 : vector<1x64xf32> to vector<8x64xf32>
    %5 = arith.addf %2, %4 : vector<8x64xf32>
    %cst_5 = arith.constant 0.000000e+00 : f32
    %6 = vector.broadcast %cst_5 : f32 to vector<8x64xf32>
    %7 = arith.maximumf %5, %6 : vector<8x64xf32>
    %c0_6 = arith.constant 0 : index
    %c0_7 = arith.constant 0 : index
    %8 = vector.load %arg4[%c0_6, %c0_7] : memref<64x1xf32, #tpu.memory_space<vmem>>, vector<64x1xf32>
    %cst_8 = arith.constant dense<0.000000e+00> : vector<8x1xf32>
    %9 = tpu.matmul %7, %8, %cst_8 {dimension_numbers = #tpu.dot_dimension_numbers<[1], [0], [0], [1], [0, 0, 1, 1], [], []>} : vector<8x64xf32>, vector<64x1xf32>, vector<8x1xf32> -> vector<8x1xf32>
    %c0_9 = arith.constant 0 : index
    %c0_10 = arith.constant 0 : index
    %10 = vector.load %arg5[%c0_9, %c0_10] : memref<1x1xf32, #tpu.memory_space<vmem>>, vector<1x1xf32>
    %11 = vector.broadcast %10 : vector<1x1xf32> to vector<8x1xf32>
    %12 = arith.addf %9, %11 : vector<8x1xf32>
    %13 = arith.negf %12 : vector<8x1xf32>
    %14 = math.exp %13 : vector<8x1xf32>
    %cst_11 = arith.constant 1.000000e+00 : f32
    %15 = vector.broadcast %cst_11 : f32 to vector<8x1xf32>
    %16 = arith.addf %15, %14 : vector<8x1xf32>
    %17 = arith.divf %15, %16 : vector<8x1xf32>
    %c0_12 = arith.constant 0 : index
    %c0_13 = arith.constant 0 : index
    %18 = vector.load %arg6[%c0_12, %c0_13] : memref<8x1xf32, #tpu.memory_space<vmem>>, vector<8x1xf32>
    tpu.vector_store %arg6[%c0_12, %c0_13], %17 {strides = array<i32>} : memref<8x1xf32, #tpu.memory_space<vmem>>, vector<8x1xf32>,
    return
  }
  func.func @transform_0(%arg0: i32) -> (i32, i32) {
    %c0_i32 = arith.constant 0 : i32
    %c0_i32_0 = arith.constant 0 : i32
    return %arg0, %c0_i32 : i32, i32
  }
  func.func @transform_1(%arg0: i32) -> (i32, i32) {
    %c0_i32 = arith.constant 0 : i32
    %c0_i32_0 = arith.constant 0 : i32
    %c0_i32_1 = arith.constant 0 : i32
    return %c0_i32, %c0_i32_0 : i32, i32
  }
  func.func @transform_2(%arg0: i32) -> (i32, i32) {
    %c0_i32 = arith.constant 0 : i32
    %c0_i32_0 = arith.constant 0 : i32
    %c0_i32_1 = arith.constant 0 : i32
    return %c0_i32, %c0_i32_0 : i32, i32
  }
  func.func @transform_3(%arg0: i32) -> (i32, i32) {
    %c0_i32 = arith.constant 0 : i32
    %c0_i32_0 = arith.constant 0 : i32
    %c0_i32_1 = arith.constant 0 : i32
    return %c0_i32, %c0_i32_0 : i32, i32
  }
  func.func @transform_4(%arg0: i32) -> (i32, i32) {
    %c0_i32 = arith.constant 0 : i32
    %c0_i32_0 = arith.constant 0 : i32
    %c0_i32_1 = arith.constant 0 : i32
    return %c0_i32, %c0_i32_0 : i32, i32
  }
  func.func @transform_5(%arg0: i32) -> (i32, i32) {
    %c0_i32 = arith.constant 0 : i32
    %c0_i32_0 = arith.constant 0 : i32
    return %arg0, %c0_i32 : i32, i32
  }
}

</mosaic_0001>

<bundles_post_ra>
// kernel: tpu_custom_call.1
= control target key start
LH: loop header
LB: loop body
LE: loop exit
PB: predicated region body
PF: predicated region fallthrough
CT: control target
= control target key end

     0   :  { %vm31_vm0 = vcmask 261120   ;;  %vm68_vm1 = vcmask 523264   ;;  %vm111_vm5 = vcmask 7168   ;;  %s204_s1 = inlined_call_operand.vmem [shape: f32[32,64], index: 1, kind: input, shape index: {}]   ;;  %s205_s3 = inlined_call_operand.vmem [shape: f32[64,1], index: 3, kind: input, shape index: {}]   ;;  %s206_s0 = inlined_call_operand.vmem [shape: f32[8,32], index: 0, kind: input, shape index: {}]   ;;  %s207_s2 = inlined_call_operand.vmem [shape: f32[1,64], index: 2, kind: input, shape index: {}]   ;;  %s208_s4 = inlined_call_operand.<no memory space> [shape: f32[1,1], index: 4, kind: input, shape index: {}]   ;;  %s209_s5 = inlined_call_operand.vmem [shape: f32[8,1], index: 5, kind: output, shape index: {}]  }
   0x1   :  { %v26_v0 = vld [vmem:[%s204_s1 + $0x18] sm:$0xff]  ;;  %v25_v1 = vld [vmem:[%s204_s1 + $0x10] sm:$0xff]  ;;  %v24_v3 = vld [vmem:[%s204_s1 + $0x8] sm:$0xff]  ;;  %v10_v13 = vstv %s208_s4 }
   0x2   :  { %47 = vmatpush.msra.mxu0 %v26_v0  ;;  %v63_v2 = vld [vmem:[%s205_s3 + $0x38] sm:$0xff]  ;;  %v62_v4 = vld [vmem:[%s205_s3 + $0x30] sm:$0xff]  ;;  %v61_v5 = vld [vmem:[%s205_s3 + $0x28] sm:$0xff]  ;;  %11 = vst [vmem:[#allocation2] sm:$0x1] %v10_v13 }
   0x3   :  { %80 = vmatpush.msra.mxu1 %v63_v2  ;;  %v23_v6 = vld [vmem:[%s204_s1] sm:$0xff]  ;;  %v59_v9 = vld [vmem:[%s205_s3 + $0x18] sm:$0xff]  ;;  %v58_v10 = vld [vmem:[%s205_s3 + $0x10] sm:$0xff] }
   0x4   :  { %48 = vmatpush.msra.mxu0 %v25_v1  ;;  %v22_v7 = vld [vmem:[%s206_s0] sm:$0xff]  ;;  %v57_v11 = vld [vmem:[%s205_s3 + $0x8] sm:$0xff] }
   0x5   :  { %81 = vmatpush.msra.mxu1 %v62_v4  ;;  %v60_v8 = vld [vmem:[%s205_s3 + $0x20] sm:$0xff] }
   0x6   :  { %49 = vmatpush.msra.mxu0 %v24_v3  ;;  %v56_v12 = vld [vmem:[%s205_s3] sm:$0xff] }
   0x7   :  { %82 = vmatpush.msra.mxu1 %v61_v5  ;;  %v120_v14 = vld [vmem:[%s207_s2] ss:$0 sm:$0xff] }
   0x8   :  { %50 = vmatpush.msra.mxu0 %v23_v6 }
   0x9   :  { %117 = vmatmul.msk.f32.vlgmr.msra.gmra.mxu0 %vm31_vm0, %v22_v7  ;;  %83 = vmatpush.msra.mxu1 %v60_v8  ;;  %v121_v18 = vld [vmem:[#allocation2] ss:$0 sm:$0xff] }
   0xb   :  { %84 = vmatpush.msra.mxu1 %v59_v9 }
   0xd   :  { %85 = vmatpush.msra.mxu1 %v58_v10 }
   0xf   :  { %86 = vmatpush.msra.mxu1 %v57_v11 }
  0x11   :  { %87 = vmatpush.msra.mxu1 %v56_v12 }
  0x86   :  { %v52_v15 = vpop.f32.mrf.mxu0 }
  0x87   :  { %v53_v16 = vadd.f32 %v120_v14, %v52_v15 }
  0x89   :  { %v55_v17 = vmax.f32 %v53_v16, 0.0 }
  0x8b   :  { %118 = vmatmul.msk.f32.vlgmr.msra.gmra.mxu1 %vm68_vm1, %v55_v17 }
 0x108   :  { %v89_v19 = vpop.f32.mrf.mxu1 }
 0x109   :  { %v90_v20 = vadd.f32 %v121_v18, %v89_v19 }
 0x10b   :  { %v119_v21 = vmul.f32 -1.442695, %v90_v20 }
 0x10d   :  { %122 = vpow2.f32 %v119_v21 }
 0x113   :  { %v123_v22 = vpop.eup %122 }
 0x114   :  { %v95_v23 = vadd.f32 1.0, %v123_v22 }
 0x116   :  { %124 = vrcp.f32 %v95_v23  ;;  %v107_v27 = vand.u32 2147483648, %v95_v23  ;;  %v105_v29 = vand.u32 2147483647, %v95_v23  ;;  %vm101_vm3 = vweird.f32 %v95_v23 }
 0x118   :  { %v108_v31 = vor.u32 1.1754944e-38, %v107_v27  ;;  %vm106_vm6 = vcmp.eq.f32.partialorder %v105_v29, 8.507059e+37 }
 0x11c   :  { %v125_v24 = vpop.eup %124 }
 0x11d   :  { %v97_v25 = vmul.f32 %v125_v24, %v95_v23  ;;  %vm102_vm2 = vweird.f32 %v125_v24 }
 0x11e   :  { %vm103_vm4 = vmor %vm101_vm3, %vm102_vm2 }
 0x11f   :  { %v98_v26 = vsub.f32 1.0, %v97_v25 }
 0x121   :  { %v99_v28 = vmul.f32 %v125_v24, %v98_v26 }
 0x123   :  { %v100_v30 = vadd.f32 %v125_v24, %v99_v28 }
 0x125   :  { %v104_v32 = vsel %vm103_vm4, %v125_v24, %v100_v30 }
 0x126   :  { %v109_v33 = vsel %vm106_vm6, %v108_v31, %v104_v32 }
 0x127   :  { %112 = vst.msk [vmem:[%s209_s5] sm:$0xff] %vm111_vm5, %v109_v33 }

</bundles_post_ra>
